<compile_context>
chip_gen: v6e
topology: v6e:2x2x1
jax: 0.10.0
libtpu: 0.0.40
codegen_flags: <defaults>
</compile_context>

<pallas_src>
import functools

import jax
import jax.numpy as jnp
from jax.experimental import pallas as pl
from jax.experimental.pallas import tpu as pltpu


def _gumbel_softmax_kernel(x_ref, *rest, scale, training):
    # Block shapes: x_ref / u_ref / o_ref are (1, C, TILE_HW).
    if training:
        u_ref, o_ref = rest
    else:
        (o_ref,) = rest

    x = x_ref[...].astype(jnp.float32)

    if training:
        u = u_ref[...].astype(jnp.float32)              # U in [0, 1)
        g = -jnp.log(-jnp.log(u + 1e-20) + 1e-20)       # Gumbel(0, 1)
        y = x + g
    else:
        y = x

    y = y * scale
    m = jnp.max(y, axis=-2, keepdims=True)              # reduce over C (sublanes)
    e = jnp.exp(y - m)
    s = jnp.sum(e, axis=-2, keepdims=True)              # (1, 1, TILE_HW)
    inv = 1.0 / s                                       # one recip per spatial pos
    o_ref[...] = (e * inv).astype(o_ref.dtype)


def _pick_tile_hw(hw, c, itemsize, target_bytes=1 << 20):
    """Largest multiple of 128 that divides hw and keeps the block ~<=1 MiB."""
    if hw % 128 != 0:
        # Full extent is always a legal last block dim (small/odd spatial case).
        return hw
    cap = max(128, target_bytes // max(1, c * itemsize))
    best = 128
    t = 128
    limit = min(hw, cap)
    while t <= limit:
        if hw % t == 0:
            best = t
        t += 128
    return best


def gumbel_softmax(logits_nchw, *, scale=1.0, training=False, key=None):
    """Pallas equivalent of GumbelSoftmax(scale=scale, dim=1).forward(logits)."""
    N, C, H, W = logits_nchw.shape
    HW = H * W

    # NCHW -> (N, C, H*W): contiguous reshape, no HBM transpose traffic.
    x = logits_nchw.reshape(N, C, HW)

    tile = _pick_tile_hw(HW, C, jnp.dtype(logits_nchw.dtype).itemsize)
    grid = (N, HW // tile)
    spec = pl.BlockSpec((1, C, tile), lambda n, h: (n, 0, h))

    kernel = functools.partial(
        _gumbel_softmax_kernel, scale=float(scale), training=bool(training)
    )

    inputs = [x]
    in_specs = [spec]
    if training:
        if key is None:
            key = jax.random.PRNGKey(0)
        u = jax.random.uniform(key, (N, C, HW), dtype=jnp.float32)
        inputs.append(u)
        in_specs.append(spec)

    out = pl.pallas_call(
        kernel,
        out_shape=jax.ShapeDtypeStruct((N, C, HW), logits_nchw.dtype),
        grid=grid,
        in_specs=in_specs,
        out_specs=spec,
        compiler_params=pltpu.CompilerParams(
            dimension_semantics=("parallel", "parallel")
        ),
    )(*inputs)

    return out.reshape(N, C, H, W)


if __name__ == "__main__":
    key = jax.random.PRNGKey(0)
    k_logits, k_noise = jax.random.split(key)

    # Shapes consistent with a conv-style NCHW input: (N, C, H, W).
    logits = jax.random.normal(k_logits, (2, 4, 16, 16), dtype=jnp.float32)

    # Eval mode (deterministic): must match softmax over dim=1.
    out_eval = gumbel_softmax(logits, scale=1.0, training=False)
    jax.block_until_ready(out_eval)
    ref = jax.nn.softmax(1.0 * logits, axis=1)
    assert out_eval.shape == logits.shape
    assert jnp.allclose(out_eval, ref, atol=1e-5, rtol=1e-5), "eval mismatch"

    # Training mode: Gumbel noise added (uniform stream from jax.random, so it
    # differs from torch.rand_like by construction).  Output must still be a
    # valid softmax over the channel axis and differ from the eval output.
    out_train = gumbel_softmax(logits, scale=1.0, training=True, key=k_noise)
    jax.block_until_ready(out_train)
    sums = jnp.sum(out_train, axis=1)
    assert out_train.shape == logits.shape
    assert jnp.allclose(sums, jnp.ones_like(sums), atol=1e-5), "train not normalized"
    assert not jnp.allclose(out_train, out_eval, atol=1e-3), "noise had no effect"

    print("KERNEL_OK")
</pallas_src>

<mosaic_0001>
module attributes {stable_mosaic.version = 11 : i64} {
  func.func @_gumbel_softmax_kernel(%arg0: i32, %arg1: i32, %arg2: memref<1x4x256xf32, #tpu.memory_space<vmem>>, %arg3: memref<1x4x256xf32, #tpu.memory_space<vmem>>) attributes {dimension_semantics = [#tpu.dimension_semantics<parallel>, #tpu.dimension_semantics<parallel>], iteration_bounds = array<i64: 2, 1>, scalar_prefetch = 0 : i64, scratch_operands = 0 : i64, tpu.core_type = #tpu.core_type<tc>, window_params = [{transform_indices = @transform_0, window_bounds = array<i64: 1, 4, 256>}, {transform_indices = @transform_1, window_bounds = array<i64: 1, 4, 256>}]} {
    %c0 = arith.constant 0 : index
    %c0_0 = arith.constant 0 : index
    %c0_1 = arith.constant 0 : index
    %0 = vector.load %arg2[%c0, %c0_0, %c0_1] : memref<1x4x256xf32, #tpu.memory_space<vmem>>, vector<1x4x256xf32>
    %cst = arith.constant 1.000000e+00 : f32
    %1 = vector.broadcast %cst : f32 to vector<1x4x256xf32>
    %2 = arith.mulf %0, %1 : vector<1x4x256xf32>
    %cst_2 = arith.constant dense<0xFF800000> : vector<1x256xf32>
    %3 = vector.multi_reduction <maximumf>, %2, %cst_2 [1] : vector<1x4x256xf32> to vector<1x256xf32>
    %4 = vector.shape_cast %3 : vector<1x256xf32> to vector<1x1x256xf32>
    %5 = vector.broadcast %4 : vector<1x1x256xf32> to vector<1x4x256xf32>
    %6 = arith.subf %2, %5 : vector<1x4x256xf32>
    %7 = math.exp %6 : vector<1x4x256xf32>
    %cst_3 = arith.constant dense<0.000000e+00> : vector<1x256xf32>
    %8 = vector.multi_reduction <add>, %7, %cst_3 [1] : vector<1x4x256xf32> to vector<1x256xf32>
    %9 = vector.shape_cast %8 : vector<1x256xf32> to vector<1x1x256xf32>
    %cst_4 = arith.constant 1.000000e+00 : f32
    %10 = vector.broadcast %cst_4 : f32 to vector<1x1x256xf32>
    %11 = arith.divf %10, %9 : vector<1x1x256xf32>
    %12 = vector.broadcast %11 : vector<1x1x256xf32> to vector<1x4x256xf32>
    %13 = arith.mulf %7, %12 : vector<1x4x256xf32>
    %c0_5 = arith.constant 0 : index
    %c0_6 = arith.constant 0 : index
    %c0_7 = arith.constant 0 : index
    %14 = vector.load %arg3[%c0_5, %c0_6, %c0_7] : memref<1x4x256xf32, #tpu.memory_space<vmem>>, vector<1x4x256xf32>
    tpu.vector_store %arg3[%c0_5, %c0_6, %c0_7], %13 {strides = array<i32>} : memref<1x4x256xf32, #tpu.memory_space<vmem>>, vector<1x4x256xf32>,
    return
  }
  func.func @transform_0(%arg0: i32, %arg1: i32) -> (i32, i32, i32) {
    %c0_i32 = arith.constant 0 : i32
    %c0_i32_0 = arith.constant 0 : i32
    return %arg0, %c0_i32, %arg1 : i32, i32, i32
  }
  func.func @transform_1(%arg0: i32, %arg1: i32) -> (i32, i32, i32) {
    %c0_i32 = arith.constant 0 : i32
    %c0_i32_0 = arith.constant 0 : i32
    return %arg0, %c0_i32, %arg1 : i32, i32, i32
  }
}

</mosaic_0001>

<bundles_post_ra>
// kernel: tpu_custom_call.1
= control target key start
LH: loop header
LB: loop body
LE: loop exit
PB: predicated region body
PF: predicated region fallthrough
CT: control target
= control target key end

     0   :  { %6 = vsyncpa [#allocation3], 0  ;;  %s657_s0 = inlined_call_operand.hbm [shape: f32[2,4,256], index: 0, kind: input, shape index: {}]   ;;  %s658_s1 = inlined_call_operand.hbm [shape: f32[2,4,256], index: 1, kind: output, shape index: {}]  }
   0x1   :  { %8 = vsyncpa [#allocation3 + $0x1], 0 }
   0x2   :  { %9 = vsyncpa [#allocation4], 0 }
   0x3   :  { %11 = vsyncpa [#allocation4 + $0x1], 0  ;;  %s515_s6 = smov 0   ;;  %s517_s7 = smov 0  }
   0x4   :  { %s519_s8 = smov 0   ;;  %s521_s9 = smov 0  }
   0x5   :  { %s523_s10 = smov 0   ;;  %s525_s11 = smov 0  }
   0x6 LB: > { %s307_s12 = sadd.s32 4294967295, %s501_s11   ;;  %s308_s13 = sadd.s32 4294967294, %s501_s11   ;;  %s501_s11 = sphi %s525_s11, %s17_s11   ;;  %s497_s10 = sphi %s523_s10, %s670_s10   ;;  %s493_s9 = sphi %s521_s9, %s669_s9   ;;  %s489_s8 = sphi %s519_s8, %s668_s8   ;;  %s485_s7 = sphi %s517_s7, %s667_s7   ;;  %s481_s6 = sphi %s515_s6, %s666_s6  }
   0x7   : > { %s29_s14 = sadd.s32 1, %s497_s10  ;;  %s38_s15 = sadd.s32 1, %s489_s8 }
   0x8   : > { %p31_p0 = scmp.ge.s32.totalorder %s29_s14, 2  ;;  %p45_p1 = scmp.ne.s32.totalorder %s489_s8, %s485_s7 }
   0x9   : > { %p46_p2 = scmp.eq.s32.totalorder %s501_s11, 0  ;;  %p51_p3 = scmp.ne.s32.totalorder %s485_s7, %s481_s6 }
   0xa   : > { %s672_s14 = smov (%p31_p0, %s29_s14), 0  ;;  %p52_p5 = scmp.eq.s32.totalorder %s307_s12, 0 }
   0xb   : > { %p556_p4 = por %p46_p2, %p45_p1  ;;  %s33_s17 = ssub.s32 %s497_s10, %s672_s14 }
   0xc   : > { %p77_p6 = scmp.eq.s32.totalorder %s307_s12, 1  ;;  %p36_p7 = scmp.eq.s32.totalorder %s33_s17, 0 }
   0xd   : > { %p562_p8 = por %p52_p5, %p51_p3  ;;  %p83_p10 = scmp.eq.s32.totalorder %s308_s13, 1 }
   0xe   : > { %p566_p9 = por %p77_p6, %p45_p1  ;;  %p336_p13 = scmp.lt.s32.totalorder %s501_s11, 2 }
   0xf   : > { %s571_s20 = scalar_select %p36_p7, %s489_s8, %s38_s15  }
  0x10   : > { %p573_p11 = por %p83_p10, %p51_p3  ;;  %s103_s22 = sand.u32 1, %s489_s8  }
  0x11   : > { %s311_s23 = sshll.u32 %s103_s22, 3  ;;  %s322_s24 = sshll.u32 %s497_s10, 7 }
  0x12   : > { %s662_s21 = scalar_select %p573_p11, 1, 0 }
  0x13   : > { %s115_s27 = scalar_lea.hbm %s657_s0, %s322_s24  ;;  %s107_s28 = scalar_lea.vmem [#allocation2], %s311_s23 }
  0x14   : > { %s117_s29 = sshll.u32 %s107_s28, 4  ;;  %p586_p0 = pnand %p336_p13, %p556_p4  ;;  %s118_s29 = int_to_ptr.vmem [resolvable:$true] %s117_s29 }
  0x15   : > { %p314_p1 = scmp.ge.s32.totalorder %s501_s11, 1  ;;  %p122_p2 = scmp.lt.s32.totalorder %s501_s11, 3 }
  0x16   : > { %s104_s2 = scalar_lea.sflag [#allocation3], %s103_s22  ;;  %p395_p3 = pneg %p586_p0 }
  0x17   : > { %s406_s3 = scalar_lea.vmem %s118_s29, 128  ;;  %s503_s4 = smov [#allocation2]  }
  0x18   : > { %p407_p5 = scmp.ne.s32.totalorder %s118_s29, %s406_s3  ;;  %s411_s5 = sshll.u32 %s503_s4, 4  ;;  %s412_s5 = int_to_ptr.vmem [resolvable:$false] %s411_s5 }
  0x19   : > { %s413_s12 = scalar_lea.vmem %s412_s5, 256  ;;  %p414_p10 = scmp.lt.s32.totalorder %s118_s29, %s412_s5 }
  0x1a   : > { %p409_p6 = pnand %p407_p5, %p395_p3  ;;  %p415_p12 = scmp.lt.s32.totalorder %s413_s12, %s406_s3 }
  0x1c   : > { %p410_p7 = pneg %p409_p6  ;;  %p416_p4 = por %p415_p12, %p414_p10 }
  0x1e   : > { %p417_p13 = pnand %p416_p4, %p410_p7 }
  0x20   : > { %420 = shalt.err (!%p417_p13)
}
  0x21   : > { %331 = dma.hbm_to_vmem [thread:$0]  (!%p586_p0), %s115_s27, 128, %s118_s29, %s104_s2  }
  0x22   : > { %p123_p11 = pnand %p314_p1, %p122_p2 }
  0x23   : > { %s601_s13 = sand.u32 (!%p123_p11), 1, %s485_s7  }
  0x24   : > { %126 = sbr.rel (%p123_p11) target bundleno = 124 (0x7c), region = 24  ;;  %s315_s15 = sshll.u32 (!%p123_p11), %s601_s13, 3 }
  0x25   : > { %s129_s16 = scalar_lea.sflag (!%p123_p11), [#allocation3], %s601_s13  ;;  %s132_s17 = scalar_lea.vmem (!%p123_p11), [#allocation2], %s315_s15 }
  0x29   : > { %472 = dma.done.wait (%p562_p8), %s129_s16, 128  }
  0x2a   : > { %474 = vsyncadd (%p562_p8), %s129_s16, 4294967168  ;;  %vm157_vm0 = vcmask 1043456   ;;  %v153_v0 = vld [vmem:[%s132_s17] sm:$0xff]  ;;  %s150_s18 = scalar_lea.vmem [#allocation5], %s315_s15  ;;  %s323_s23 = sshll.u32 %s493_s9, 7 }
  0x2b   : > { %v155_v1 = vcombine.high %v153_v0, %v153_v0  ;;  %v158_v2 = vsel %vm157_vm0, %v153_v0, -inf  ;;  %s223_s22 = sshll.u32 %s150_s18, 4  ;;  %s221_s26 = scalar_lea.hbm %s658_s1, %s323_s23  ;;  %s224_s22 = int_to_ptr.vmem [resolvable:$true] %s223_s22 }
  0x2c   : > { %v159_v3 = vrot.slane %v158_v2, 4  ;;  %s207_s27 = scalar_lea.sflag [#allocation4], %s601_s13  ;;  %s421_s28 = scalar_lea.vmem %s224_s22, 128 }
  0x2d   : > { %v165_v4 = vsel %vm157_vm0, %v155_v1, -inf  ;;  %p422_p8 = scmp.ne.s32.totalorder %s224_s22, %s421_s28  ;;  %s504_s29 = smov [#allocation5]  }
  0x2e   : > { %v160_v5 = vmax.f32 %v158_v2, %v159_v3  ;;  %v166_v6 = vrot.slane %v165_v4, 4  ;;  %s425_s30 = sshll.u32 %s504_s29, 4  ;;  %s426_s30 = int_to_ptr.vmem [resolvable:$false] %s425_s30 }
  0x2f   : > { %p423_p11 = pnand %p422_p8, %p566_p9  ;;  %s427_s2 = scalar_lea.vmem %s426_s30, 256 }
  0x30   : > { %v161_v7 = vrot.slane %v160_v5, 2  ;;  %v167_v8 = vmax.f32 %v165_v4, %v166_v6  ;;  %p428_p0 = scmp.lt.s32.totalorder %s224_s22, %s426_s30  ;;  %p429_p1 = scmp.lt.s32.totalorder %s427_s2, %s421_s28 }
  0x31   : > { %p424_p12 = pneg %p423_p11 }
  0x32   : > { %v162_v9 = vmax.f32 %v160_v5, %v161_v7  ;;  %v168_v10 = vrot.slane %v167_v8, 2  ;;  %p430_p2 = por %p429_p1, %p428_p0 }
  0x34   : > { %v163_v11 = vrot.slane %v162_v9, 1  ;;  %v169_v12 = vmax.f32 %v167_v8, %v168_v10  ;;  %p431_p3 = pnand %p430_p2, %p424_p12 }
  0x36   : > { %v164_v13 = vmax.f32 %v162_v9, %v163_v11  ;;  %v170_v14 = vrot.slane %v169_v12, 1 }
  0x38   : > { %v171_v15 = vmax.f32 %v169_v12, %v170_v14 }
  0x3a   : > { %v174_v16 = vcombine.low %v164_v13, %v171_v15 }
  0x3c   : > { %v176_v17 = vsub.f32 %v153_v0, %v174_v16 }
  0x3e   : > { %v177_v18 = vmul.f32 1.442695, %v176_v17 }
  0x40   : > { %387 = vpow2.f32 %v177_v18 }
  0x4d   : > { %v388_v19 = vpop.eup %387 }
  0x4e   : > { %v180_v20 = vcombine.high %v388_v19, %v388_v19  ;;  %v182_v21 = vsel %vm157_vm0, %v388_v19, 0.0 }
  0x4f   : > { %v183_v22 = vrot.slane %v182_v21, 4 }
  0x50   : > { %v189_v23 = vsel %vm157_vm0, %v180_v20, 0.0 }
  0x51   : > { %v184_v24 = vadd.f32 %v183_v22, %v182_v21  ;;  %v190_v25 = vrot.slane %v189_v23, 4 }
  0x53   : > { %v185_v26 = vrot.slane %v184_v24, 2  ;;  %v191_v27 = vadd.f32 %v190_v25, %v189_v23 }
  0x55   : > { %v186_v28 = vadd.f32 %v185_v26, %v184_v24  ;;  %v192_v29 = vrot.slane %v191_v27, 2 }
  0x57   : > { %v187_v30 = vrot.slane %v186_v28, 1  ;;  %v193_v31 = vadd.f32 %v192_v29, %v191_v27 }
  0x59   : > { %v188_v32 = vadd.f32 %v187_v30, %v186_v28  ;;  %v194_v33 = vrot.slane %v193_v31, 1 }
  0x5b   : > { %v195_v34 = vadd.f32 %v194_v33, %v193_v31  ;;  %389 = vrcp.f32 %v188_v32 }
  0x5d   : > { %391 = vrcp.f32 %v195_v34 }
  0x68   : > { %v390_v35 = vpop.eup %389 }
  0x6a   : > { %v392_v36 = vpop.eup %391 }
  0x6b   : > { %v202_v37 = vcombine.low %v390_v35, %v392_v36 }
  0x6d   : > { %v204_v38 = vmul.f32 %v388_v19, %v202_v37 }
  0x6f   : > { %205 = vst [vmem:[%s150_s18] sm:$0xff] %v204_v38 }
  0x70   : > { %434 = shalt.err (!%p431_p3)
}
  0x71   : > { %s435_s9 = scalar_lea.hbm %s221_s26, 128  ;;  %s439_s5 = scalar_lea.hbm %s658_s1, 256 }
  0x72   : > { %p436_p5 = scmp.ne.s32.totalorder %s221_s26, %s435_s9  ;;  %p440_p10 = scmp.lt.s32.totalorder %s221_s26, %s658_s1 }
  0x73   : > { %p441_p4 = scmp.lt.s32.totalorder %s439_s5, %s435_s9 }
  0x74   : > { %p437_p6 = pnand %p436_p5, %p566_p9 }
  0x75   : > { %p442_p13 = por %p441_p4, %p440_p10 }
  0x76   : > { %p438_p7 = pneg %p437_p6 }
  0x78   : > { %p443_p8 = pnand %p442_p13, %p438_p7 }
  0x7a   : > { %446 = shalt.err (!%p443_p8)
}
  0x7b   : > { %326 = dma.vmem_to_hbm [thread:$0]  (%p566_p9), %s224_s22, 128, %s221_s26, %s207_s27  }
  0x7c PF: > { %s235_s15 = sand.u32 1, %s481_s6   ;;  %p664_p11 = scmp.ne.s32.totalorder %s662_s21, 0 }
  0x7d   : > { %p665_p12 = scmp.ge.s32.totalorder %s501_s11, 2  ;;  %s236_s16 = scalar_lea.sflag [#allocation4], %s235_s15 }
  0x7f   : > { %p333_p0 = pnand %p665_p12, %p664_p11 }
  0x81   : > { %p334_p1 = pneg %p333_p0 }
  0x83   : > { %476 = dma.done.wait (%p334_p1), %s236_s16, 128  }
  0x84   : > { %478 = vsyncadd (%p334_p1), %s236_s16, 4294967168  ;;  %s17_s11 = sadd.s32 1, %s501_s11   ;;  %s666_s6 = smov %s485_s7 }
  0x85   : > { %p14_p2 = scmp.ge.s32.totalorder %s17_s11, 4   ;;  %s667_s7 = smov %s489_s8 }
  0x86   : > { %s668_s8 = smov %s571_s20  ;;  %s669_s9 = smov %s497_s10 }
  0x87   : > { %s670_s10 = smov %s672_s14  ;;  %16 = sbr.rel (!%p14_p2) target bundleno = 6 (0x6), region = 69 }
  0x8c   :  { %241 = vsyncpa [#allocation3], 1 }
  0x8d   :  { %243 = vsyncpa [#allocation3 + $0x1], 1 }
  0x8e   :  { %244 = vsyncpa [#allocation4], 1 }
  0x8f   :  { %246 = vsyncpa [#allocation4 + $0x1], 1 }

</bundles_post_ra>
